<compile_context>
chip_gen: v7x
topology: tpu7x:2x2x1
jax: 0.10.0
libtpu: 0.0.40
codegen_flags: <defaults>
</compile_context>

<pallas_src>
import functools
import numpy as np
import jax
import jax.numpy as jnp
from jax import lax
from jax.experimental import pallas as pl
from jax.experimental.pallas import tpu as pltpu

# ---- small synthetic LlamaConfig ----
HIDDEN = 64
NUM_HEADS = 2
NUM_KV_HEADS = 2           # == NUM_HEADS -> num_key_value_groups == 1
HEAD_DIM = HIDDEN // NUM_HEADS
MAX_POS = 128
ROPE_THETA = 10000.0
BATCH = 2
SEQ = 8


# ---------------- fused Pallas kernel ----------------
def fused_attention_kernel(x_ref, wqkv_ref, wo_ref, rope_ref, o_ref,
                           *, num_heads, num_kv_heads, head_dim, batch, seq):
    """QKV proj + RoPE + causal attention + O proj, all in VMEM.

    x_ref:    (B*S, H)              activations (f32; cast to bf16 in-kernel)
    wqkv_ref: (H, (nH+2*nKV)*D)     fused [Wq | Wk | Wv], pre-transposed, bf16
    wo_ref:   (nH*D, H)             output projection, pre-transposed, bf16
    rope_ref: (B*S, 4*D)            packed [cos_q*scale | sin_q*sign*scale |
                                             cos_k       | sin_k*sign]
    o_ref:    (B*S, H)
    """
    D = head_dim
    half = D // 2
    k_off = num_heads * D
    v_off = (num_heads + num_kv_heads) * D
    groups = num_heads // num_kv_heads
    BS = batch * seq

    # One MXU pass produces Q, K and V together (bf16 operands, f32 acc).
    x = x_ref[...].astype(jnp.bfloat16)
    qkv = jnp.dot(x, wqkv_ref[...], preferred_element_type=jnp.float32)

    rope = rope_ref[...]                       # (BS, 4*D), f32
    cos_q = rope[:, 0 * D:1 * D]               # softmax scale folded in
    sin_q = rope[:, 1 * D:2 * D]               # sign + scale folded in
    cos_k = rope[:, 2 * D:3 * D]
    sin_k = rope[:, 3 * D:4 * D]               # sign folded in

    # Block-causal mask built in-kernel (no dense HBM bias). Batch id is
    # computed div-free by counting batch boundaries; causal via iota compare.
    row = lax.broadcasted_iota(jnp.int32, (BS, BS), 0)
    col = lax.broadcasted_iota(jnp.int32, (BS, BS), 1)
    row_b = jnp.zeros((BS, BS), jnp.int32)
    col_b = jnp.zeros((BS, BS), jnp.int32)
    for b in range(1, batch):                  # static unroll (tiny)
        row_b = row_b + jnp.where(row >= b * seq, 1, 0)
        col_b = col_b + jnp.where(col >= b * seq, 1, 0)
    valid = (row_b == col_b) & (col <= row)

    def rope_fn(t, cos, sin_signed):
        # x*cos + rotate_half(x)*sin == x*cos + roll(x, D/2) * (sign*sin),
        # with sign (and, for queries, the softmax scale) pre-folded.
        return t * cos + pltpu.roll(t, shift=half, axis=1) * sin_signed

    heads_out = []
    for h in range(num_heads):                 # static unroll (tiny)
        kvh = h // groups                      # repeat_kv handled via index
        q_h = qkv[:, h * D:(h + 1) * D]
        k_h = qkv[:, k_off + kvh * D:k_off + (kvh + 1) * D]
        v_h = qkv[:, v_off + kvh * D:v_off + (kvh + 1) * D]

        qr = rope_fn(q_h, cos_q, sin_q)        # already carries softmax scale
        kr = rope_fn(k_h, cos_k, sin_k)

        # Contract on the last dim of both operands: no explicit kr.T.
        s = lax.dot_general(qr.astype(jnp.bfloat16), kr.astype(jnp.bfloat16),
                            dimension_numbers=(((1,), (1,)), ((), ())),
                            preferred_element_type=jnp.float32)
        s = jnp.where(valid, s, -jnp.inf)      # causal + same-batch mask
        m = jnp.max(s, axis=-1, keepdims=True)
        p = jnp.exp(s - m)
        l = jnp.sum(p, axis=-1, keepdims=True)

        # EUP reciprocal instead of a VALU divide; one Newton step on the
        # (B*S, 1) vector restores f32-level accuracy for ~free.
        inv_l = pl.reciprocal(l, approx=True)
        inv_l = inv_l * (2.0 - l * inv_l)

        o_h = jnp.dot(p.astype(jnp.bfloat16), v_h.astype(jnp.bfloat16),
                      preferred_element_type=jnp.float32) * inv_l
        heads_out.append(o_h)

    # One long-K output projection instead of nH tiny per-head matmuls + adds.
    o_all = jnp.concatenate(heads_out, axis=1).astype(jnp.bfloat16)
    out = jnp.dot(o_all, wo_ref[...], preferred_element_type=jnp.float32)
    o_ref[...] = out.astype(o_ref.dtype)


# ---------------- forward wrapper (no per-call prep work) ----------------
def llama_attention_forward(hidden_states, wqkv_bf16, wo_bf16, rope_packed):
    B, S, H = hidden_states.shape
    x2d = hidden_states.reshape(B * S, H)
    kern = functools.partial(fused_attention_kernel,
                             num_heads=NUM_HEADS, num_kv_heads=NUM_KV_HEADS,
                             head_dim=HEAD_DIM, batch=B, seq=S)
    out = pl.pallas_call(
        kern,
        out_shape=jax.ShapeDtypeStruct((B * S, H), hidden_states.dtype),
    )(x2d, wqkv_bf16, wo_bf16, rope_packed)
    return out.reshape(B, S, H)


# ---------------- one-time (per sequence-layout) precompute ----------------
def precompute_rope_tables(params, position_ids, batch, seq):
    """Pack [cos_q*scale | sin_q*sign*scale | cos_k | sin_k*sign] -> (B*S, 4*D)."""
    D = HEAD_DIM
    sign = jnp.concatenate([-jnp.ones((D // 2,), jnp.float32),
                            jnp.ones((D // 2,), jnp.float32)])
    key_pos = jnp.arange(seq, dtype=jnp.int32)
    scale = params["scale"]
    cos_q = jnp.tile(params["cos_cached"][position_ids] * scale, (batch, 1))
    sin_q = jnp.tile(params["sin_cached"][position_ids] * sign * scale, (batch, 1))
    cos_k = jnp.tile(params["cos_cached"][key_pos], (batch, 1))
    sin_k = jnp.tile(params["sin_cached"][key_pos] * sign, (batch, 1))
    return jnp.concatenate([cos_q, sin_q, cos_k, sin_k], axis=1).astype(jnp.float32)


# ---------------- pure-JAX reference for validation ----------------
def reference_forward(hidden_states, params, position_ids):
    B, S, H = hidden_states.shape
    x2d = hidden_states.reshape(B * S, H)
    q = (x2d @ params["wq_t"]).reshape(B, S, NUM_HEADS, HEAD_DIM).transpose(0, 2, 1, 3)
    k = (x2d @ params["wk_t"]).reshape(B, S, NUM_KV_HEADS, HEAD_DIM).transpose(0, 2, 1, 3)
    v = (x2d @ params["wv_t"]).reshape(B, S, NUM_KV_HEADS, HEAD_DIM).transpose(0, 2, 1, 3)

    def rotate_half(x):
        d = x.shape[-1] // 2
        return jnp.concatenate([-x[..., d:], x[..., :d]], axis=-1)

    cos_q = params["cos_cached"][position_ids][None, None]
    sin_q = params["sin_cached"][position_ids][None, None]
    key_pos = jnp.arange(S)
    cos_k = params["cos_cached"][key_pos][None, None]
    sin_k = params["sin_cached"][key_pos][None, None]

    q = q * cos_q + rotate_half(q) * sin_q
    k = k * cos_k + rotate_half(k) * sin_k

    groups = NUM_HEADS // NUM_KV_HEADS
    k = jnp.repeat(k, groups, axis=1)
    v = jnp.repeat(v, groups, axis=1)

    s = jnp.einsum("bhqd,bhkd->bhqk", q, k) * params["scale"]
    mask = jnp.tril(jnp.ones((S, S), dtype=bool))
    s = jnp.where(mask[None, None], s, -jnp.inf)
    p = jax.nn.softmax(s, axis=-1)
    o = jnp.einsum("bhqk,bhkd->bhqd", p, v)
    o = o.transpose(0, 2, 1, 3).reshape(B * S, H)
    return (o @ params["wo_t"]).reshape(B, S, H)


def make_params(key):
    ks = jax.random.split(key, 4)
    init = lambda k, shape: (0.02 * jax.random.normal(k, shape, jnp.float32))
    # PyTorch Linear weight is (out, in); we store the transpose (in, out).
    wq_t = init(ks[0], (HIDDEN, NUM_HEADS * HEAD_DIM))
    wk_t = init(ks[1], (HIDDEN, NUM_KV_HEADS * HEAD_DIM))
    wv_t = init(ks[2], (HIDDEN, NUM_KV_HEADS * HEAD_DIM))
    wo_t = init(ks[3], (NUM_HEADS * HEAD_DIM, HIDDEN))

    # LlamaRotaryEmbedding cache.
    inv_freq = 1.0 / (ROPE_THETA ** (np.arange(0, HEAD_DIM, 2, dtype=np.float32) / HEAD_DIM))
    t = np.arange(MAX_POS, dtype=np.float32)
    freqs = np.outer(t, inv_freq)
    emb = np.concatenate([freqs, freqs], axis=-1)
    cos_cached = jnp.asarray(np.cos(emb), dtype=jnp.float32)
    sin_cached = jnp.asarray(np.sin(emb), dtype=jnp.float32)

    # softmax_scale = 1 / sqrt(head_dim computed in fp16), like the reference.
    scale = float(np.float16(1.0) / np.float16(np.sqrt(np.float16(HEAD_DIM))))

    # Hoisted, offline-prepared kernel operands.
    wqkv_t = jnp.concatenate([wq_t, wk_t, wv_t], axis=1)        # (H, (nH+2nKV)*D)
    wqkv_bf16 = wqkv_t.astype(jnp.bfloat16)
    wo_bf16 = wo_t.astype(jnp.bfloat16)

    return dict(wq_t=wq_t, wk_t=wk_t, wv_t=wv_t, wo_t=wo_t,
                wqkv_bf16=wqkv_bf16, wo_bf16=wo_bf16,
                cos_cached=cos_cached, sin_cached=sin_cached, scale=scale)


if __name__ == "__main__":
    key = jax.random.PRNGKey(0)
    k_x, k_p = jax.random.split(key)
    hidden_states = jax.random.normal(k_x, (BATCH, SEQ, HIDDEN), jnp.float32)
    params = make_params(k_p)
    position_ids = jnp.arange(SEQ, dtype=jnp.int32)

    # One-time precompute (static for fixed S / prefill position_ids).
    rope_packed = precompute_rope_tables(params, position_ids, BATCH, SEQ)

    out = llama_attention_forward(hidden_states, params["wqkv_bf16"],
                                  params["wo_bf16"], rope_packed)
    out = jax.block_until_ready(out)

    ref = reference_forward(hidden_states, params, position_ids)
    # bf16 MXU operands with f32 accumulation -> slightly looser tolerance.
    np.testing.assert_allclose(np.asarray(out), np.asarray(ref),
                               atol=2e-3, rtol=2e-2)

    print("KERNEL_OK")
</pallas_src>

<mosaic_0001>
module attributes {stable_mosaic.version = 11 : i64} {
  func.func @fused_attention_kernel(%arg0: memref<16x64xf32, #tpu.memory_space<vmem>>, %arg1: memref<64x192xbf16, #tpu.memory_space<vmem>>, %arg2: memref<64x64xbf16, #tpu.memory_space<vmem>>, %arg3: memref<16x128xf32, #tpu.memory_space<vmem>>, %arg4: memref<16x64xf32, #tpu.memory_space<vmem>>) attributes {dimension_semantics = [], scalar_prefetch = 0 : i64, scratch_operands = 0 : i64, tpu.core_type = #tpu.core_type<tc>} {
    %c0 = arith.constant 0 : index
    %c0_0 = arith.constant 0 : index
    %0 = vector.load %arg0[%c0, %c0_0] : memref<16x64xf32, #tpu.memory_space<vmem>>, vector<16x64xf32>
    %1 = arith.truncf %0 : vector<16x64xf32> to vector<16x64xbf16>
    %c0_1 = arith.constant 0 : index
    %c0_2 = arith.constant 0 : index
    %2 = vector.load %arg1[%c0_1, %c0_2] : memref<64x192xbf16, #tpu.memory_space<vmem>>, vector<64x192xbf16>
    %cst = arith.constant dense<0.000000e+00> : vector<16x192xf32>
    %3 = tpu.matmul %1, %2, %cst {dimension_numbers = #tpu.dot_dimension_numbers<[1], [0], [0], [1], [0, 0, 1, 1], [], []>} : vector<16x64xbf16>, vector<64x192xbf16>, vector<16x192xf32> -> vector<16x192xf32>
    %c0_3 = arith.constant 0 : index
    %c0_4 = arith.constant 0 : index
    %4 = vector.load %arg3[%c0_3, %c0_4] : memref<16x128xf32, #tpu.memory_space<vmem>>, vector<16x128xf32>
    %5 = vector.extract_strided_slice %4 {offsets = [0, 0], sizes = [16, 32], strides = [1, 1]} : vector<16x128xf32> to vector<16x32xf32>
    %6 = vector.extract_strided_slice %4 {offsets = [0, 32], sizes = [16, 32], strides = [1, 1]} : vector<16x128xf32> to vector<16x32xf32>
    %7 = vector.extract_strided_slice %4 {offsets = [0, 64], sizes = [16, 32], strides = [1, 1]} : vector<16x128xf32> to vector<16x32xf32>
    %8 = vector.extract_strided_slice %4 {offsets = [0, 96], sizes = [16, 32], strides = [1, 1]} : vector<16x128xf32> to vector<16x32xf32>
    %9 = tpu.iota {dimensions = array<i32: 0>} : vector<16x16xi32>
    %10 = tpu.iota {dimensions = array<i32: 1>} : vector<16x16xi32>
    %c0_i32 = arith.constant 0 : i32
    %11 = vector.broadcast %c0_i32 : i32 to vector<16x16xi32>
    %c0_i32_5 = arith.constant 0 : i32
    %12 = vector.broadcast %c0_i32_5 : i32 to vector<16x16xi32>
    %c8_i32 = arith.constant 8 : i32
    %13 = vector.broadcast %c8_i32 : i32 to vector<16x16xi32>
    %14 = arith.cmpi sge, %9, %13 : vector<16x16xi32>
    %c1_i32 = arith.constant 1 : i32
    %c0_i32_6 = arith.constant 0 : i32
    %15 = vector.broadcast %c1_i32 : i32 to vector<16x16xi32>
    %16 = vector.broadcast %c0_i32_6 : i32 to vector<16x16xi32>
    %17 = arith.select %14, %15, %16 : vector<16x16xi1>, vector<16x16xi32>
    %18 = arith.addi %11, %17 : vector<16x16xi32>
    %c8_i32_7 = arith.constant 8 : i32
    %19 = vector.broadcast %c8_i32_7 : i32 to vector<16x16xi32>
    %20 = arith.cmpi sge, %10, %19 : vector<16x16xi32>
    %c1_i32_8 = arith.constant 1 : i32
    %c0_i32_9 = arith.constant 0 : i32
    %21 = vector.broadcast %c1_i32_8 : i32 to vector<16x16xi32>
    %22 = vector.broadcast %c0_i32_9 : i32 to vector<16x16xi32>
    %23 = arith.select %20, %21, %22 : vector<16x16xi1>, vector<16x16xi32>
    %24 = arith.addi %12, %23 : vector<16x16xi32>
    %25 = arith.cmpi eq, %18, %24 : vector<16x16xi32>
    %26 = arith.cmpi sle, %10, %9 : vector<16x16xi32>
    %27 = arith.andi %25, %26 : vector<16x16xi1>
    %28 = vector.extract_strided_slice %3 {offsets = [0, 0], sizes = [16, 32], strides = [1, 1]} : vector<16x192xf32> to vector<16x32xf32>
    %29 = vector.extract_strided_slice %3 {offsets = [0, 64], sizes = [16, 32], strides = [1, 1]} : vector<16x192xf32> to vector<16x32xf32>
    %30 = vector.extract_strided_slice %3 {offsets = [0, 128], sizes = [16, 32], strides = [1, 1]} : vector<16x192xf32> to vector<16x32xf32>
    %31 = arith.mulf %28, %5 : vector<16x32xf32>
    %c16_i32 = arith.constant 16 : i32
    %32 = tpu.dynamic_rotate %28 by %c16_i32 dim 1 : vector<16x32xf32>, i32 -> vector<16x32xf32>
    %33 = arith.mulf %32, %6 : vector<16x32xf32>
    %34 = arith.addf %31, %33 : vector<16x32xf32>
    %35 = arith.mulf %29, %7 : vector<16x32xf32>
    %c16_i32_10 = arith.constant 16 : i32
    %36 = tpu.dynamic_rotate %29 by %c16_i32_10 dim 1 : vector<16x32xf32>, i32 -> vector<16x32xf32>
    %37 = arith.mulf %36, %8 : vector<16x32xf32>
    %38 = arith.addf %35, %37 : vector<16x32xf32>
    %39 = arith.truncf %34 : vector<16x32xf32> to vector<16x32xbf16>
    %40 = arith.truncf %38 : vector<16x32xf32> to vector<16x32xbf16>
    %cst_11 = arith.constant dense<0.000000e+00> : vector<16x16xf32>
    %41 = tpu.matmul %39, %40, %cst_11 {dimension_numbers = #tpu.dot_dimension_numbers<[1], [1], [0], [0], [0, 0, 1, 0], [], []>} : vector<16x32xbf16>, vector<16x32xbf16>, vector<16x16xf32> -> vector<16x16xf32>
    %cst_12 = arith.constant 0xFF800000 : f32
    %42 = vector.broadcast %cst_12 : f32 to vector<16x16xf32>
    %43 = arith.select %27, %41, %42 : vector<16x16xi1>, vector<16x16xf32>
    %cst_13 = arith.constant dense<0xFF800000> : vector<16xf32>
    %44 = vector.multi_reduction <maximumf>, %43, %cst_13 [1] : vector<16x16xf32> to vector<16xf32>
    %45 = vector.shape_cast %44 : vector<16xf32> to vector<16x1xf32>
    %46 = vector.broadcast %45 : vector<16x1xf32> to vector<16x16xf32>
    %47 = arith.subf %43, %46 : vector<16x16xf32>
    %48 = math.exp %47 : vector<16x16xf32>
    %cst_14 = arith.constant dense<0.000000e+00> : vector<16xf32>
    %49 = vector.multi_reduction <add>, %48, %cst_14 [1] : vector<16x16xf32> to vector<16xf32>
    %50 = vector.shape_cast %49 : vector<16xf32> to vector<16x1xf32>
    %51 = tpu.reciprocal %50 {approx = true} : vector<16x1xf32> -> vector<16x1xf32>
    %52 = arith.mulf %50, %51 : vector<16x1xf32>
    %cst_15 = arith.constant 2.000000e+00 : f32
    %53 = vector.broadcast %cst_15 : f32 to vector<16x1xf32>
    %54 = arith.subf %53, %52 : vector<16x1xf32>
    %55 = arith.mulf %51, %54 : vector<16x1xf32>
    %56 = arith.truncf %48 : vector<16x16xf32> to vector<16x16xbf16>
    %57 = arith.truncf %30 : vector<16x32xf32> to vector<16x32xbf16>
    %cst_16 = arith.constant dense<0.000000e+00> : vector<16x32xf32>
    %58 = tpu.matmul %56, %57, %cst_16 {dimension_numbers = #tpu.dot_dimension_numbers<[1], [0], [0], [1], [0, 0, 1, 1], [], []>} : vector<16x16xbf16>, vector<16x32xbf16>, vector<16x32xf32> -> vector<16x32xf32>
    %59 = vector.broadcast %55 : vector<16x1xf32> to vector<16x32xf32>
    %60 = arith.mulf %58, %59 : vector<16x32xf32>
    %61 = vector.extract_strided_slice %3 {offsets = [0, 32], sizes = [16, 32], strides = [1, 1]} : vector<16x192xf32> to vector<16x32xf32>
    %62 = vector.extract_strided_slice %3 {offsets = [0, 96], sizes = [16, 32], strides = [1, 1]} : vector<16x192xf32> to vector<16x32xf32>
    %63 = vector.extract_strided_slice %3 {offsets = [0, 160], sizes = [16, 32], strides = [1, 1]} : vector<16x192xf32> to vector<16x32xf32>
    %64 = arith.mulf %61, %5 : vector<16x32xf32>
    %c16_i32_17 = arith.constant 16 : i32
    %65 = tpu.dynamic_rotate %61 by %c16_i32_17 dim 1 : vector<16x32xf32>, i32 -> vector<16x32xf32>
    %66 = arith.mulf %65, %6 : vector<16x32xf32>
    %67 = arith.addf %64, %66 : vector<16x32xf32>
    %68 = arith.mulf %62, %7 : vector<16x32xf32>
    %c16_i32_18 = arith.constant 16 : i32
    %69 = tpu.dynamic_rotate %62 by %c16_i32_18 dim 1 : vector<16x32xf32>, i32 -> vector<16x32xf32>
    %70 = arith.mulf %69, %8 : vector<16x32xf32>
    %71 = arith.addf %68, %70 : vector<16x32xf32>
    %72 = arith.truncf %67 : vector<16x32xf32> to vector<16x32xbf16>
    %73 = arith.truncf %71 : vector<16x32xf32> to vector<16x32xbf16>
    %cst_19 = arith.constant dense<0.000000e+00> : vector<16x16xf32>
    %74 = tpu.matmul %72, %73, %cst_19 {dimension_numbers = #tpu.dot_dimension_numbers<[1], [1], [0], [0], [0, 0, 1, 0], [], []>} : vector<16x32xbf16>, vector<16x32xbf16>, vector<16x16xf32> -> vector<16x16xf32>
    %cst_20 = arith.constant 0xFF800000 : f32
    %75 = vector.broadcast %cst_20 : f32 to vector<16x16xf32>
    %76 = arith.select %27, %74, %75 : vector<16x16xi1>, vector<16x16xf32>
    %cst_21 = arith.constant dense<0xFF800000> : vector<16xf32>
    %77 = vector.multi_reduction <maximumf>, %76, %cst_21 [1] : vector<16x16xf32> to vector<16xf32>
    %78 = vector.shape_cast %77 : vector<16xf32> to vector<16x1xf32>
    %79 = vector.broadcast %78 : vector<16x1xf32> to vector<16x16xf32>
    %80 = arith.subf %76, %79 : vector<16x16xf32>
    %81 = math.exp %80 : vector<16x16xf32>
    %cst_22 = arith.constant dense<0.000000e+00> : vector<16xf32>
    %82 = vector.multi_reduction <add>, %81, %cst_22 [1] : vector<16x16xf32> to vector<16xf32>
    %83 = vector.shape_cast %82 : vector<16xf32> to vector<16x1xf32>
    %84 = tpu.reciprocal %83 {approx = true} : vector<16x1xf32> -> vector<16x1xf32>
    %85 = arith.mulf %83, %84 : vector<16x1xf32>
    %cst_23 = arith.constant 2.000000e+00 : f32
    %86 = vector.broadcast %cst_23 : f32 to vector<16x1xf32>
    %87 = arith.subf %86, %85 : vector<16x1xf32>
    %88 = arith.mulf %84, %87 : vector<16x1xf32>
    %89 = arith.truncf %81 : vector<16x16xf32> to vector<16x16xbf16>
    %90 = arith.truncf %63 : vector<16x32xf32> to vector<16x32xbf16>
    %cst_24 = arith.constant dense<0.000000e+00> : vector<16x32xf32>
    %91 = tpu.matmul %89, %90, %cst_24 {dimension_numbers = #tpu.dot_dimension_numbers<[1], [0], [0], [1], [0, 0, 1, 1], [], []>} : vector<16x16xbf16>, vector<16x32xbf16>, vector<16x32xf32> -> vector<16x32xf32>
    %92 = vector.broadcast %88 : vector<16x1xf32> to vector<16x32xf32>
    %93 = arith.mulf %91, %92 : vector<16x32xf32>
    %94 = tpu.concatenate %60, %93 in 1 : vector<16x32xf32>, vector<16x32xf32> -> vector<16x64xf32>
    %95 = arith.truncf %94 : vector<16x64xf32> to vector<16x64xbf16>
    %c0_25 = arith.constant 0 : index
    %c0_26 = arith.constant 0 : index
    %96 = vector.load %arg2[%c0_25, %c0_26] : memref<64x64xbf16, #tpu.memory_space<vmem>>, vector<64x64xbf16>
    %cst_27 = arith.constant dense<0.000000e+00> : vector<16x64xf32>
    %97 = tpu.matmul %95, %96, %cst_27 {dimension_numbers = #tpu.dot_dimension_numbers<[1], [0], [0], [1], [0, 0, 1, 1], [], []>} : vector<16x64xbf16>, vector<64x64xbf16>, vector<16x64xf32> -> vector<16x64xf32>
    %c0_28 = arith.constant 0 : index
    %c0_29 = arith.constant 0 : index
    %98 = vector.load %arg4[%c0_28, %c0_29] : memref<16x64xf32, #tpu.memory_space<vmem>>, vector<16x64xf32>
    tpu.vector_store %arg4[%c0_28, %c0_29], %97 {strides = array<i32>} : memref<16x64xf32, #tpu.memory_space<vmem>>, vector<16x64xf32>,
    return
  }
}

</mosaic_0001>

<bundles_post_ra>
// kernel: tpu_custom_call.1
= control target key start
LH: loop header
LB: loop body
LE: loop exit
PB: predicated region body
PF: predicated region fallthrough
CT: control target
= control target key end

     0   :  { %9 = vsyncpa [#allocation3], 0  ;;  %s1224_s0 = inlined_call_operand.hbm [shape: f32[16,64], index: 0, kind: input, shape index: {}]   ;;  %s1225_s1 = inlined_call_operand.hbm [shape: bf16[64,192], index: 1, kind: input, shape index: {}]   ;;  %s1226_s2 = inlined_call_operand.hbm [shape: bf16[64,64], index: 2, kind: input, shape index: {}]   ;;  %s1227_s3 = inlined_call_operand.hbm [shape: f32[16,128], index: 3, kind: input, shape index: {}]   ;;  %s1228_s4 = inlined_call_operand.hbm [shape: f32[16,64], index: 4, kind: output, shape index: {}]  }
   0x1   :  { %10 = vsyncpa [#allocation6], 0 }
   0x2   :  { %11 = vsyncpa [#allocation9], 0 }
   0x3   :  { %12 = vsyncpa [#allocation4], 0  ;;  %s947_s15 = smov [#allocation5]   ;;  %s948_s17 = smov [#allocation2]  }
   0x4   :  { %s30_s16 = sshll.u32 %s947_s15, 4  ;;  %s18_s18 = sshll.u32 %s948_s17, 4  ;;  %s31_s16 = int_to_ptr.vmem [resolvable:$true] %s30_s16  ;;  %s990_s18 = int_to_ptr.vmem [resolvable:$true] %s18_s18 }
   0x5   :  { %s829_s21 = scalar_lea.hbm %s1225_s1, 1024 }
   0x6   :  { %p830_p0 = scmp.ne.s32.totalorder %s1225_s1, %s829_s21  ;;  %p833_p1 = scmp.lt.u32.totalorder %s829_s21, %s1225_s1 }
   0x8   :  { %p835_p2 = pnand %p833_p1, %p830_p0 }
   0xa   :  { %838 = shalt.err (!%p835_p2)
}
   0xb   :  { %s839_s26 = scalar_lea.vmem %s31_s16, 1024  ;;  %p844_p4 = scmp.lt.s32.totalorder %s31_s16, %s31_s16 }
   0xc   :  { %p840_p3 = scmp.ne.s32.totalorder %s31_s16, %s839_s26  ;;  %p845_p5 = scmp.lt.s32.totalorder %s839_s26, %s839_s26 }
   0xe   :  { %p846_p6 = por %p845_p5, %p844_p4 }
  0x10   :  { %p847_p7 = pnand %p846_p6, %p840_p3 }
  0x12   :  { %850 = shalt.err (!%p847_p7)
}
  0x13   :  { %s949_s27 = smov 128   ;;  %s950_s28 = smov 8  }
  0x14   :  { %36 = dma.hbm_to_vmem [thread:$0]  %s1225_s1, 1024, %s31_s16, [#allocation6], %s949_s27, %s949_s27, %s950_s28  }
  0x15   :  { %s851_s7 = scalar_lea.hbm %s1224_s0, 256 }
  0x16   :  { %p852_p8 = scmp.ne.s32.totalorder %s1224_s0, %s851_s7  ;;  %p855_p9 = scmp.lt.u32.totalorder %s851_s7, %s1224_s0 }
  0x18   :  { %p857_p10 = pnand %p855_p9, %p852_p8 }
  0x1a   :  { %860 = shalt.err (!%p857_p10)
}
  0x1b   :  { %s861_s12 = scalar_lea.vmem %s990_s18, 256  ;;  %p866_p12 = scmp.lt.s32.totalorder %s990_s18, %s990_s18 }
  0x1c   :  { %p862_p11 = scmp.ne.s32.totalorder %s990_s18, %s861_s12  ;;  %p867_p13 = scmp.lt.s32.totalorder %s861_s12, %s861_s12 }
  0x1e   :  { %p868_p0 = por %p867_p13, %p866_p12 }
  0x20   :  { %p869_p1 = pnand %p868_p0, %p862_p11 }
  0x22   :  { %872 = shalt.err (!%p869_p1)
}
  0x23   :  { %24 = dma.hbm_to_vmem [thread:$0]  %s1224_s0, 256, %s990_s18, [#allocation3], %s949_s27, %s949_s27, %s950_s28  }
  0x24   :  { %s951_s14 = smov [#allocation7]   ;;  %s873_s19 = scalar_lea.hbm %s1226_s2, 512 }
  0x25   :  { %s42_s15 = sshll.u32 %s951_s14, 4  ;;  %p874_p2 = scmp.ne.s32.totalorder %s1226_s2, %s873_s19  ;;  %s43_s15 = int_to_ptr.vmem [resolvable:$true] %s42_s15 }
  0x26   :  { %p877_p3 = scmp.lt.u32.totalorder %s873_s19, %s1226_s2 }
  0x28   :  { %p879_p4 = pnand %p877_p3, %p874_p2 }
  0x2a   :  { %882 = shalt.err (!%p879_p4)
}
  0x2b   :  { %s883_s24 = scalar_lea.vmem %s43_s15, 512  ;;  %p888_p6 = scmp.lt.s32.totalorder %s43_s15, %s43_s15 }
  0x2c   :  { %p884_p5 = scmp.ne.s32.totalorder %s43_s15, %s883_s24  ;;  %p889_p7 = scmp.lt.s32.totalorder %s883_s24, %s883_s24 }
  0x2e   :  { %p890_p8 = por %p889_p7, %p888_p6 }
  0x30   :  { %p891_p9 = pnand %p890_p8, %p884_p5 }
  0x32   :  { %894 = shalt.err (!%p891_p9)
}
  0x33   :  { %s952_s0 = smov 64   ;;  %s953_s18 = smov 4  }
  0x34   :  { %48 = dma.hbm_to_vmem [thread:$0]  %s1226_s2, 512, %s43_s15, [#allocation6], %s952_s0, %s952_s0, %s953_s18  }
  0x35   :  { %s954_s29 = smov [#allocation8]   ;;  %s895_s7 = scalar_lea.hbm %s1227_s3, 256 }
  0x36   :  { %s54_s30 = sshll.u32 %s954_s29, 4  ;;  %p896_p10 = scmp.ne.s32.totalorder %s1227_s3, %s895_s7  ;;  %s55_s30 = int_to_ptr.vmem [resolvable:$true] %s54_s30 }
  0x37   :  { %p899_p11 = scmp.lt.u32.totalorder %s895_s7, %s1227_s3 }
  0x39   :  { %p901_p12 = pnand %p899_p11, %p896_p10 }
  0x3b   :  { %904 = shalt.err (!%p901_p12)
}
  0x3c   :  { %s905_s12 = scalar_lea.vmem %s55_s30, 256  ;;  %p910_p0 = scmp.lt.s32.totalorder %s55_s30, %s55_s30 }
  0x3d   :  { %p906_p13 = scmp.ne.s32.totalorder %s55_s30, %s905_s12  ;;  %p911_p1 = scmp.lt.s32.totalorder %s905_s12, %s905_s12 }
  0x3f   :  { %p912_p2 = por %p911_p1, %p910_p0 }
  0x41   :  { %p913_p3 = pnand %p912_p2, %p906_p13 }
  0x43   :  { %916 = shalt.err (!%p913_p3)
}
  0x44   :  { %60 = dma.hbm_to_vmem [thread:$0]  %s1227_s3, 256, %s55_s30, [#allocation9], %s949_s27, %s949_s27, %s950_s28  }
  0x45   :  { %939 = dma.done.wait [#allocation3], 256  }
  0x46   :  { %940 = vsyncadd [#allocation3], 4294967040 }
  0x47   :  { %941 = dma.done.wait [#allocation6], 1536  }
  0x48   :  { %942 = vsyncadd [#allocation6], 4294965760 }
  0x49   :  { %943 = dma.done.wait [#allocation9], 256  }
  0x4a   :  { %944 = vsyncadd [#allocation9], 4294967040  ;;  %v955_v0 = vmov 0   ;;  %v797_v1 = vld [vmem:[#allocation5 + $0x4] ss:$8 sps:$4 sm:$0xff]   ;;  %v74_v9 = vld [vmem:[#allocation2] sm:$0xff] }
  0x4b   :  { %161 = vmatprep.mubr.bf16.mxu0 %v955_v0  ;;  %v799_v2 = vld [vmem:[#allocation5] ss:$8 sps:$4 sm:$0xff]   ;;  %129 = vmatprep.subr.bf16.mxu0 %v797_v1  ;;  %v800_v3 = vld [vmem:[#allocation5 + $0x14] ss:$8 sps:$4 sm:$0xff]   ;;  %v802_v4 = vld [vmem:[#allocation5 + $0x10] ss:$8 sps:$4 sm:$0xff]  }
  0x4c   :  { %130 = vmatpush1.bf16.msra.mxu0 %v799_v2  ;;  %v803_v5 = vld [vmem:[#allocation5 + $0x24] ss:$8 sps:$4 sm:$0xff]   ;;  %v805_v6 = vld [vmem:[#allocation5 + $0x20] ss:$8 sps:$4 sm:$0xff]   ;;  %v806_v7 = vld [vmem:[#allocation5 + $0x34] ss:$8 sps:$4 sm:$0xff]  }
  0x4d   :  { %131 = vmatprep.subr.bf16.mxu0 %v800_v3  ;;  %v808_v8 = vld [vmem:[#allocation5 + $0x30] ss:$8 sps:$4 sm:$0xff]   ;;  %vm125_vm0 = vcmask 523264   ;;  %s956_s3 = smov 32   ;;  %vm193_vm1 = vcmask 1047808   ;;  %v1071_v22 = vld [vmem:[#allocation8] sm:$0xff] }
  0x4e   :  { %v75_v10 = vld [vmem:[#allocation2 + $0x8] sm:$0xff]  ;;  %s957_s13 = smov 48   ;;  %v1076_v24 = vld [vmem:[#allocation8 + $0x8] sm:$0xff]  ;;  %s958_s14 = smov 112   ;;  %v959_v37 = vmov 0.0   ;;  %vm960_vm2 = vmmov 0  }
  0x4f   :  { %v76_v11 = vpack.c.bf16 %v75_v10, %v74_v9  ;;  %738 = vmatprep.subr.bf16.mxu1 %v959_v37  ;;  %740 = vmatprep.mubr.msk.bf16.mxu1 %vm960_vm2, %v959_v37  ;;  %s961_s15 = smov 96   ;;  %vm269_vm3 = vcmask 261120   ;;  %s962_s16 = smov 80   ;;  %vm319_vm10 = vcmask 130048  }
  0x50   :  { %132 = vmatpush1.bf16.msra.mxu0 %v802_v4  ;;  %s963_s17 = smov 16   ;;  %s964_s19 = smov [#allocation10]  }
  0x51   :  { %133 = vmatprep.subr.bf16.mxu0 %v803_v5  ;;  %s690_s20 = sshll.u32 %s964_s19, 4  ;;  %s691_s20 = int_to_ptr.vmem [resolvable:$true] %s690_s20 }
  0x52   :  { %s917_s21 = scalar_lea.vmem %s691_s20, 256  ;;  %p922_p5 = scmp.lt.s32.totalorder %s691_s20, %s691_s20 }
  0x53   :  { %p918_p4 = scmp.ne.s32.totalorder %s691_s20, %s917_s21  ;;  %p923_p6 = scmp.lt.s32.totalorder %s917_s21, %s917_s21 }
  0x54   :  { %134 = vmatpush1.bf16.msra.mxu0 %v805_v6 }
  0x55   :  { %135 = vmatprep.subr.bf16.mxu0 %v806_v7  ;;  %p924_p7 = por %p923_p6, %p922_p5 }
  0x57   :  { %p925_p8 = pnand %p924_p7, %p918_p4 }
  0x58   :  { %136 = vmatpush1.bf16.msra.mxu0 %v808_v8 }
  0x59   :  { %762 = vmatprep.subr.bf16.mxu0 %v959_v37 }
  0x5b   :  { %712 = vmatmul.mubr.msk.bf16.vlgmr.msra.gmra.mrb[0].mxu0 %vm125_vm0, %v76_v11 }
  0x5c   :  { %770 = vmatprep.mubr.msk.bf16.mxu0 %vm960_vm2, %v959_v37 }
 0x12e   :  { %v1057_v12 = vpop.f32.mrb[0].mxu0 }
 0x12f   :  { %228 = vrot.lane.b32.xlu0 %v1057_v12, %s952_s0  ;;  %v165_v13 = vpop.f32.mrb[1].mxu0  ;;  %v191_v39 = vmul.f32 %v1071_v22, %v1057_v12 }
 0x130   :  { %v1061_v14 = vpop.f32.mrb[2].mxu0 }
 0x131   :  { %v169_v15 = vpop.f32.mrb[3].mxu0  ;;  %v192_v40 = vmul.f32 %v1076_v24, %v1061_v14 }
 0x132   :  { %v1063_v16 = vpack.c.bf16 %v169_v15, %v165_v13 }
 0x133   :  { %230 = vrot.lane.b32.xlu0 %v1061_v14, %s952_s0 }
 0x1a1   :  { %v229_v17 = vpop.permute.xlu0 %228 }
 0x1a2   :  { %234 = vrot.lane.b32.xlu1 %v229_v17, %s956_s3 }
 0x1a5   :  { %v231_v18 = vpop.permute.xlu0 %230 }
 0x1a6   :  { %237 = vrot.lane.b32.xlu1 %v231_v18, %s956_s3 }
 0x214   :  { %v235_v19 = vpop.permute.xlu1 %234 }
 0x215   :  { %v236_v20 = vsel %vm193_vm1, %v235_v19, %v229_v17 }
 0x216   :  { %240 = vrot.lane.b32.xlu0 %v236_v20, %s956_s3 }
 0x218   :  { %v238_v21 = vpop.permute.xlu1 %237 }
 0x219   :  { %v239_v23 = vsel %vm193_vm1, %v238_v21, %v231_v18 }
 0x21a   :  { %246 = vrot.lane.b32.xlu0 %v1071_v22, %s957_s13  ;;  %242 = vrot.lane.b32.xlu1 %v239_v23, %s956_s3 }
 0x21e   :  { %194 = vrot.lane.b32.xlu0 %v1057_v12, %s956_s3  ;;  %248 = vrot.lane.b32.xlu1 %v1076_v24, %s957_s13 }
 0x222   :  { %197 = vrot.lane.b32.xlu1 %v1061_v14, %s956_s3 }
 0x288   :  { %v241_v25 = vpop.permute.xlu0 %240 }
 0x289   :  { %v244_v26 = vsel %vm193_vm1, %v241_v25, %v229_v17 }
 0x28c   :  { %v1084_v27 = vpop.permute.xlu0 %246  ;;  %v243_v28 = vpop.permute.xlu1 %242 }
 0x28d   :  { %v252_v29 = vmul.f32 %v1084_v27, %v244_v26  ;;  %v245_v30 = vsel %vm193_vm1, %v243_v28, %v231_v18 }
 0x28f   :  { %256 = vrot.lane.b32.xlu0 %v252_v29, %s957_s13 }
 0x290   :  { %v195_v31 = vpop.permute.xlu0 %194  ;;  %v1088_v32 = vpop.permute.xlu1 %248 }
 0x291   :  { %v253_v33 = vmul.f32 %v1088_v32, %v245_v30  ;;  %v196_v34 = vsel %vm193_vm1, %v195_v31, %v1057_v12 }
 0x293   :  { %200 = vrot.lane.b32.xlu0 %v196_v34, %s956_s3  ;;  %258 = vrot.lane.b32.xlu1 %v253_v33, %s957_s13 }
 0x294   :  { %v198_v35 = vpop.permute.xlu1 %197 }
 0x295   :  { %v199_v36 = vsel %vm193_vm1, %v198_v35, %v1061_v14 }
 0x297   :  { %208 = vrot.lane.b32.xlu0 %v1071_v22, %s958_s14  ;;  %202 = vrot.lane.b32.xlu1 %v199_v36, %s956_s3 }
 0x29b   :  { %210 = vrot.lane.b32.xlu1 %v1076_v24, %s958_s14 }
 0x301   :  { %v257_v38 = vpop.permute.xlu0 %256 }
 0x302   :  { %v262_v43 = vadd.f32 %v257_v38, %v191_v39 }
 0x305   :  { %v201_v41 = vpop.permute.xlu0 %200  ;;  %v259_v42 = vpop.permute.xlu1 %258 }
 0x306   :  { %v263_v44 = vadd.f32 %v259_v42, %v192_v40  ;;  %v204_v46 = vsel %vm193_vm1, %v201_v41, %v1057_v12 }
 0x308   :  { %v265_v45 = vpack.c.bf16 %v263_v44, %v262_v43 }
 0x309   :  { %v209_v47 = vpop.permute.xlu0 %208  ;;  %v203_v48 = vpop.permute.xlu1 %202 }
 0x30a   :  { %v214_v49 = vmul.f32 %v209_v47, %v204_v46  ;;  %267 = vrot.lane.b32.xlu0 %v265_v45, %s952_s0  ;;  %v205_v50 = vsel %vm193_vm1, %v203_v48, %v1061_v14 }
 0x30c   :  { %218 = vrot.lane.b32.xlu1 %v214_v49, %s958_s14 }
 0x30d   :  { %v1114_v51 = vpop.permute.xlu1 %210 }
 0x30e   :  { %v215_v52 = vmul.f32 %v1114_v51, %v205_v50 }
 0x310   :  { %432 = vrot.lane.b32.xlu1 %v1057_v12, %s956_s3  ;;  %220 = vrot.lane.b32.xlu0 %v215_v52, %s958_s14 }
 0x314   :  { %402 = vrot.lane.b32.xlu1 %v1057_v12, %s961_s15  ;;  %434 = vrot.lane.b32.xlu0 %v1061_v14, %s956_s3 }
 0x318   :  { %404 = vrot.lane.b32.xlu0 %v1061_v14, %s961_s15 }
 0x37c   :  { %v268_v53 = vpop.permute.xlu0 %267 }
 0x37d   :  { %v274_v54 = vsel %vm269_vm3, %v268_v53, 0 }
 0x37e   :  { %v219_v55 = vpop.permute.xlu1 %218  ;;  %739 = vmatpush3.bf16.xpose.msra.mxu1 %v274_v54 }
 0x37f   :  { %744 = vmatprep.subr.bf16.mxu1 %v959_v37  ;;  %v224_v58 = vadd.f32 %v219_v55, %v191_v39 }
 0x382   :  { %v433_v56 = vpop.permute.xlu1 %432  ;;  %v221_v57 = vpop.permute.xlu0 %220 }
 0x383   :  { %v225_v59 = vadd.f32 %v221_v57, %v192_v40  ;;  %438 = vrot.lane.b32.xlu1 %v433_v56, %s956_s3 }
 0x385   :  { %v264_v60 = vpack.c.bf16 %v225_v59, %v224_v58 }
 0x386   :  { %v403_v61 = vpop.permute.xlu1 %402  ;;  %v435_v62 = vpop.permute.xlu0 %434 }
 0x387   :  { %408 = vrot.lane.b32.xlu1 %v403_v61, %s956_s3  ;;  %741 = vmatmul.mubr.msk.bf16.vlgmr.msra.gmra.mrb[0].mxu1 %vm269_vm3, %v264_v60 }
 0x388   :  { %441 = vrot.lane.b32.xlu0 %v435_v62, %s956_s3  ;;  %745 = vmatpush3.bf16.msra.mxu1 %v1063_v16 }
 0x389   :  { %746 = vmatprep.mubr.msk.bf16.mxu1 %vm960_vm2, %v959_v37  ;;  %750 = vmatprep.subr.bf16.mxu1 %v959_v37 }
 0x38a   :  { %v405_v63 = vpop.permute.xlu0 %404 }
 0x38c   :  { %411 = vrot.lane.b32.xlu0 %v405_v63, %s956_s3 }
 0x3f5   :  { %v439_v0 = vpop.permute.xlu1 %438 }
 0x3f6   :  { %v440_v1 = vsel %vm193_vm1, %v439_v0, %v433_v56 }
 0x3f7   :  { %444 = vrot.lane.b32.xlu1 %v440_v1, %s956_s3 }
 0x3f9   :  { %v409_v2 = vpop.permute.xlu1 %408 }
 0x3fa   :  { %v442_v3 = vpop.permute.xlu0 %441  ;;  %v410_v4 = vsel %vm193_vm1, %v409_v2, %v403_v61 }
 0x3fb   :  { %414 = vrot.lane.b32.xlu1 %v410_v4, %s956_s3  ;;  %v443_v5 = vsel %vm193_vm1, %v442_v3, %v435_v62 }
 0x3fc   :  { %446 = vrot.lane.b32.xlu0 %v443_v5, %s956_s3 }
 0x3fe   :  { %v412_v6 = vpop.permute.xlu0 %411 }
 0x3ff   :  { %394 = vrot.lane.b32.xlu1 %v1071_v22, %s956_s3  ;;  %v413_v7 = vsel %vm193_vm1, %v412_v6, %v405_v63 }
 0x400   :  { %416 = vrot.lane.b32.xlu0 %v413_v7, %s956_s3 }
 0x404   :  { %396 = vrot.lane.b32.xlu0 %v1076_v24, %s956_s3 }
 0x45a   :  { %v310_v8 = vpop.f32.mrb[0].mxu1 }
 0x45b   :  { %v742_v9 = vpop.f32.mrb[1].mxu1 }
 0x45c   :  { %v313_v10 = vpop.f32.mrb[2].mxu1 }
 0x45d   :  { %v743_v11 = vpop.f32.mrb[3].mxu1 }
 0x469   :  { %v445_v13 = vpop.permute.xlu1 %444 }
 0x46a   :  { %v448_v15 = vsel %vm193_vm1, %v445_v13, %v433_v56 }
 0x46b   :  { %v450_v17 = vmul.f32 %v448_v15, %v1084_v27  ;;  %v174_v27 = vlaneseq }
 0x46d   :  { %454 = vrot.lane.b32.xlu1 %v450_v17, %s962_s16  ;;  %v415_v18 = vpop.permute.xlu1 %414  ;;  %v175_v28 = vshrl.u32 %v174_v27, 7  ;;  %v178_v29 = vand.u32 127, %v174_v27  ;;  %v810_v27 = vld [vmem:[#allocation7 + $0x8] sm:$0xff]  }
 0x46e   :  { %v418_v19 = vsel %vm193_vm1, %v415_v18, %v403_v61  ;;  %v447_v20 = vpop.permute.xlu0 %446 }
 0x46f   :  { %v420_v21 = vmul.f32 %v418_v19, %v209_v47  ;;  %v449_v22 = vsel %vm193_vm1, %v447_v20, %v435_v62  ;;  %vm183_vm4 = vcmp.ge.s32.totalorder %v178_v29, 8  ;;  %v176_v30 = vadd.s32 8, %v175_v28 }
 0x470   :  { %v451_v23 = vmul.f32 %v449_v22, %v1088_v32  ;;  %vm724_vm5 = vmneg %vm183_vm4  ;;  %vm187_vm6 = vcmp.le.s32.totalorder %v178_v29, %v175_v28  ;;  %v811_v28 = vld [vmem:[#allocation7 + $0x10] sm:$0xff]  }
 0x471   :  { %424 = vrot.lane.b32.xlu1 %v420_v21, %s963_s17  ;;  %vm188_vm7 = vcmp.le.s32.totalorder %v178_v29, %v176_v30  ;;  %vm1155_vm8 = vmand %vm724_vm5, %vm187_vm6  ;;  %v395_v38 = vpop.permute.xlu1 %394 }
 0x472   :  { %456 = vrot.lane.b32.xlu0 %v451_v23, %s962_s16  ;;  %v417_v24 = vpop.permute.xlu0 %416  ;;  %vm1159_vm9 = vmand %vm183_vm4, %vm188_vm7  ;;  %v317_v33 = vsel %vm1155_vm8, %v310_v8, -inf  ;;  %v400_v41 = vmul.f32 %v395_v38, %v1057_v12 }
 0x473   :  { %v419_v25 = vsel %vm193_vm1, %v417_v24, %v405_v63  ;;  %v318_v34 = vsel %vm1159_vm9, %v313_v10, -inf  ;;  %v320_v36 = vsel %vm319_vm10, %v317_v33, -inf }
 0x474   :  { %v421_v26 = vmul.f32 %v419_v25, %v1114_v51  ;;  %v323_v35 = vsel %vm319_vm10, %v318_v34, -inf }
 0x476   :  { %426 = vrot.lane.b32.xlu0 %v421_v26, %s963_s17  ;;  %v397_v39 = vpop.permute.xlu0 %396  ;;  %v809_v26 = vld [vmem:[#allocation7] sm:$0xff]  }
 0x477   :  { %v401_v42 = vmul.f32 %v397_v39, %v1061_v14  ;;  %763 = vmatpush3.bf16.msra.mxu0 %v809_v26 }
 0x478   :  { %764 = vmatprep.subr.bf16.mxu0 %v959_v37 }
 0x47b   :  { %765 = vmatpush3.bf16.msra.mxu0 %v810_v27 }
 0x47c   :  { %766 = vmatprep.subr.bf16.mxu0 %v959_v37 }
 0x47f   :  { %767 = vmatpush3.bf16.msra.mxu0 %v811_v28 }
 0x480   :  { %768 = vmatprep.subr.bf16.mxu0 %v959_v37 }
 0x495   :  { %324 = vmax.xlane.f32.xlu0 %v323_v35  ;;  %321 = vmax.xlane.f32.xlu1 %v320_v36  ;;  %v812_v35 = vld [vmem:[#allocation7 + $0x18] sm:$0xff]  }
 0x496   :  { %769 = vmatpush3.bf16.msra.mxu0 %v812_v35 }
 0x4df   :  { %v455_v40 = vpop.permute.xlu1 %454 }
 0x4e0   :  { %v460_v44 = vadd.f32 %v455_v40, %v400_v41 }
 0x4e3   :  { %v425_v46 = vpop.permute.xlu1 %424 }
 0x4e4   :  { %v457_v43 = vpop.permute.xlu0 %456  ;;  %v430_v49 = vadd.f32 %v425_v46, %v400_v41 }
 0x4e5   :  { %v461_v45 = vadd.f32 %v457_v43, %v401_v42 }
 0x4e7   :  { %v463_v47 = vpack.c.bf16 %v461_v45, %v460_v44 }
 0x4e8   :  { %v427_v48 = vpop.permute.xlu0 %426 }
 0x4e9   :  { %v431_v50 = vadd.f32 %v427_v48, %v401_v42  ;;  %468 = vrot.lane.b32.xlu0 %v463_v47, %s956_s3 }
 0x4eb   :  { %v462_v51 = vpack.c.bf16 %v431_v50, %v430_v49 }
 0x4ed   :  { %465 = vrot.lane.b32.xlu1 %v462_v51, %s961_s15 }
 0x522   :  { %v325_v52 = vpop.xlane.xlu0 %324  ;;  %v322_v53 = vpop.xlane.xlu1 %321 }
 0x523   :  { %v327_v54 = vsub.f32 %v318_v34, %v325_v52  ;;  %v326_v55 = vsub.f32 %v317_v33, %v322_v53 }
 0x525   :  { %v330_v12 = vmul.f32 1.442695, %v327_v54  ;;  %v328_v56 = vmul.f32 1.442695, %v326_v55 }
 0x527   :  { %813 = vpow2.f32 %v330_v12 }
 0x528   :  { %815 = vpow2.f32 %v328_v56 }
 0x531   :  { %v814_v14 = vpop.eup %813 }
 0x532   :  { %v816_v57 = vpop.eup %815  ;;  %v335_v25 = vsel %vm319_vm10, %v814_v14, 0.0 }
 0x533   :  { %v346_v58 = vpack.c.bf16 %v814_v14, %v816_v57  ;;  %v332_v24 = vsel %vm319_vm10, %v816_v57, 0.0 }
 0x535   :  { %747 = vmatmul.mubr.msk.bf16.vlgmr.msra.gmra.mrb[4].mxu1 %vm319_vm10, %v346_v58 }
 0x536   :  { %752 = vmatprep.mubr.msk.bf16.mxu1 %vm960_vm2, %v959_v37 }
 0x55b   :  { %v469_v59 = vpop.permute.xlu0 %468 }
 0x55c   :  { %v474_v60 = vsel %vm269_vm3, %v469_v59, 0 }
 0x55d   :  { %751 = vmatpush3.bf16.xpose.msra.mxu1 %v474_v60 }
 0x55e   :  { %756 = vmatprep.subr.bf16.mxu1 %v959_v37 }
 0x55f   :  { %v466_v61 = vpop.permute.xlu1 %465 }
 0x564   :  { %753 = vmatmul.mubr.msk.bf16.vlgmr.msra.gmra.mrb[8].mxu1 %vm269_vm3, %v466_v61 }
 0x565   :  { %758 = vmatprep.mubr.msk.bf16.mxu1 %vm960_vm2, %v959_v37 }
 0x608   :  { %v1181_v62 = vpop.f32.mrb[4].mxu1 }
 0x609   :  { %v748_v63 = vpop.f32.mrb[5].mxu1 }
 0x60a   :  { %v1183_v0 = vpop.f32.mrb[6].mxu1 }
 0x60b   :  { %v749_v1 = vpop.f32.mrb[7].mxu1 }
 0x637   :  { %v510_v2 = vpop.f32.mrb[8].mxu1 }
 0x638   :  { %v517_v3 = vsel %vm1155_vm8, %v510_v2, -inf  ;;  %v754_v4 = vpop.f32.mrb[9].mxu1 }
 0x639   :  { %v513_v5 = vpop.f32.mrb[10].mxu1  ;;  %v519_v6 = vsel %vm319_vm10, %v517_v3, -inf }
 0x63a   :  { %v518_v7 = vsel %vm1159_vm9, %v513_v5, -inf  ;;  %520 = vmax.xlane.f32.xlu1 %v519_v6  ;;  %v755_v8 = vpop.f32.mrb[11].mxu1 }
 0x63b   :  { %v522_v9 = vsel %vm319_vm10, %v518_v7, -inf }
 0x63c   :  { %523 = vmax.xlane.f32.xlu0 %v522_v9 }
 0x652   :  { %547 = vrot.lane.b32.xlu0 %v1063_v16, %s961_s15 }
 0x6c7   :  { %v521_v10 = vpop.xlane.xlu1 %520 }
 0x6c8   :  { %v525_v11 = vsub.f32 %v517_v3, %v521_v10 }
 0x6c9   :  { %v524_v13 = vpop.xlane.xlu0 %523 }
 0x6ca   :  { %v527_v15 = vmul.f32 1.442695, %v525_v11  ;;  %v526_v17 = vsub.f32 %v518_v7, %v524_v13 }
 0x6cc   :  { %817 = vpow2.f32 %v527_v15  ;;  %v529_v18 = vmul.f32 1.442695, %v526_v17 }
 0x6cd   :  { %v548_v19 = vpop.permute.xlu0 %547 }
 0x6ce   :  { %819 = vpow2.f32 %v529_v18  ;;  %757 = vmatpush3.bf16.msra.mxu1 %v548_v19 }
 0x6d6   :  { %v818_v20 = vpop.eup %817 }
 0x6d7   :  { %v531_v21 = vsel %vm319_vm10, %v818_v20, 0.0 }
 0x6d8   :  { %v820_v22 = vpop.eup %819  ;;  %532 = vadd.xlane.f32.xlu1 %v531_v21 }
 0x6d9   :  { %v545_v23 = vpack.c.bf16 %v820_v22, %v818_v20  ;;  %v534_v16 = vsel %vm319_vm10, %v820_v22, 0.0 }
 0x6db   :  { %759 = vmatmul.mubr.msk.bf16.vlgmr.msra.gmra.mrb[12].mxu1 %vm319_vm10, %v545_v23 }
 0x6dc   :  { %535 = vadd.xlane.f32.xlu1 %v534_v16 }
 0x6e0   :  { %333 = vadd.xlane.f32.xlu1 %v332_v24 }
 0x6e4   :  { %336 = vadd.xlane.f32.xlu1 %v335_v25 }
 0x765   :  { %v533_v29 = vpop.xlane.xlu1 %532 }
 0x766   :  { %821 = vrcp.f32 %v533_v29 }
 0x769   :  { %v536_v30 = vpop.xlane.xlu1 %535 }
 0x76a   :  { %823 = vrcp.f32 %v536_v30 }
 0x76d   :  { %v334_v47 = vpop.xlane.xlu1 %333 }
 0x76e   :  { %825 = vrcp.f32 %v334_v47 }
 0x770   :  { %v822_v31 = vpop.eup %821 }
 0x771   :  { %v539_v33 = vmul.f32 %v822_v31, %v533_v29  ;;  %v337_v48 = vpop.xlane.xlu1 %336 }
 0x772   :  { %827 = vrcp.f32 %v337_v48 }
 0x773   :  { %v541_v36 = vsub.f32 2.0, %v539_v33 }
 0x774   :  { %v824_v32 = vpop.eup %823 }
 0x775   :  { %v540_v34 = vmul.f32 %v824_v32, %v536_v30  ;;  %v543_v40 = vmul.f32 %v822_v31, %v541_v36 }
 0x777   :  { %v542_v38 = vsub.f32 2.0, %v540_v34 }
 0x778   :  { %v826_v49 = vpop.eup %825 }
 0x779   :  { %v544_v42 = vmul.f32 %v824_v32, %v542_v38  ;;  %v340_v51 = vmul.f32 %v826_v49, %v334_v47 }
 0x77b   :  { %v342_v53 = vsub.f32 2.0, %v340_v51 }
 0x77c   :  { %v828_v50 = vpop.eup %827 }
 0x77d   :  { %v341_v52 = vmul.f32 %v828_v50, %v337_v48  ;;  %v344_v55 = vmul.f32 %v826_v49, %v342_v53 }
 0x77f   :  { %v343_v54 = vsub.f32 2.0, %v341_v52  ;;  %v392_v14 = vmul.f32 %v1181_v62, %v344_v55 }
 0x781   :  { %v345_v12 = vmul.f32 %v828_v50, %v343_v54 }
 0x783   :  { %v393_v57 = vmul.f32 %v1183_v0, %v345_v12 }
 0x7ae   :  { %v587_v39 = vpop.f32.mrb[12].mxu1 }
 0x7af   :  { %v760_v41 = vpop.f32.mrb[13].mxu1  ;;  %v594_v44 = vmul.f32 %v587_v39, %v543_v40 }
 0x7b0   :  { %v590_v43 = vpop.f32.mrb[14].mxu1 }
 0x7b1   :  { %v595_v45 = vmul.f32 %v590_v43, %v544_v42  ;;  %v761_v37 = vpop.f32.mrb[15].mxu1 }
 0x7b3   :  { %v792_v46 = vpack.i.bf16 %v595_v45, %v594_v44 }
 0x7b5   :  { %793 = vrot.lane.b32.xlu1 %v792_v46, %s956_s3 }
 0x827   :  { %v794_v56 = vpop.permute.xlu1 %793 }
 0x828   :  { %v796_v58 = vunpack.i.h.bf16 %v794_v56  ;;  %v795_v59 = vunpack.i.l.bf16 %v794_v56 }
 0x82a   :  { %v605_v60 = vsel %vm269_vm3, %v393_v57, %v796_v58  ;;  %v604_v61 = vsel %vm269_vm3, %v392_v14, %v795_v59 }
 0x82b   :  { %v606_v63 = vpack.c.bf16 %v605_v60, %v604_v61 }
 0x82d   :  { %771 = vmatmul.mubr.msk.bf16.vlgmr.msra.gmra.mrb[4].mxu0 %vm125_vm0, %v606_v63 }
 0x900   :  { %v676_v1 = vpop.f32.mrb[4].mxu0 }
 0x901   :  { %683 = vst.msk [vmem:[#allocation10] sm:$0xff] %vm125_vm0, %v676_v1  ;;  %v772_v2 = vpop.f32.mrb[5].mxu0 }
 0x902   :  { %v679_v3 = vpop.f32.mrb[6].mxu0 }
 0x903   :  { %684 = vst.msk [vmem:[#allocation10 + $0x8] sm:$0xff] %vm125_vm0, %v679_v3  ;;  %v773_v62 = vpop.f32.mrb[7].mxu0 }
 0x904   :  { %928 = shalt.err (!%p925_p8)
}
 0x905   :  { %s929_s24 = scalar_lea.hbm %s1228_s4, 256 }
 0x906   :  { %p930_p9 = scmp.ne.s32.totalorder %s1228_s4, %s929_s24  ;;  %p933_p10 = scmp.lt.u32.totalorder %s929_s24, %s1228_s4 }
 0x908   :  { %p935_p11 = pnand %p933_p10, %p930_p9 }
 0x90a   :  { %938 = shalt.err (!%p935_p11)
}
 0x90b   :  { %696 = dma.vmem_to_hbm [thread:$0]  %s691_s20, 256, %s1228_s4, [#allocation4], %s949_s27, %s949_s27, %s950_s28  }
 0x90c   :  { %945 = dma.done.wait [#allocation4], 256  }
 0x90d   :  { %946 = vsyncadd [#allocation4], 4294967040 }
 0x90e   :  { %700 = vsyncpa [#allocation3], 1 }
 0x90f   :  { %701 = vsyncpa [#allocation6], 1 }
 0x910   :  { %702 = vsyncpa [#allocation9], 1 }
 0x911   :  { %703 = vsyncpa [#allocation4], 1 }

</bundles_post_ra>
